<compile_context>
chip_gen: v6e
topology: v6e:2x2x1
jax: 0.10.0
libtpu: 0.0.40
codegen_flags: <defaults>
</compile_context>

<pallas_src>
import functools

import jax
import jax.numpy as jnp
from jax.experimental import pallas as pl
from jax.experimental.pallas import tpu as pltpu

_LANE = 128      # f32 lane tile (last dim)
_SUBLANE = 8     # f32 sublane tile (second-to-last dim)


def _round_up(x, m):
    return ((x + m - 1) // m) * m


def mlp_kernel(xt_ref, w1_ref, b1_ref, w2_ref, b2_ref, ot_ref):
    # Feature-major compute: columns are batch samples (lane dim), rows are
    # features.  Both matmuls run on the MXU with f32 accumulation; bias add
    # and ReLU on the VPU.  All operands are resident in VMEM and the output
    # tile is a dense (out_pad x tb) slab -> unmasked stores.
    xt = xt_ref[...]                                           # (in, tb)
    ht = jnp.dot(w1_ref[...], xt, preferred_element_type=jnp.float32)
    ht = jnp.maximum(ht + b1_ref[...], 0.0)                    # (hidden, tb)
    ot = jnp.dot(w2_ref[...], ht, preferred_element_type=jnp.float32)
    ot_ref[...] = (ot + b2_ref[...]).astype(ot_ref.dtype)      # (out_pad, tb)


def prepare_params(w1, b1, w2, b2):
    """One-time conversion of PyTorch-layout params to the kernel layout.

    PyTorch nn.Linear stores W as (out_features, in_features), which is
    exactly the feature-major layout the kernel wants, so no transpose is
    needed; only the output layer's feature dim is zero-padded to a sublane
    multiple (done once here, NOT per forward call).
    """
    hidden = w1.shape[0]
    out_size = w2.shape[0]
    out_pad = _round_up(max(out_size, _SUBLANE), _SUBLANE)
    w2p = jnp.pad(w2, ((0, out_pad - out_size), (0, 0)))
    b2p = jnp.pad(b2, (0, out_pad - out_size))
    return w1, b1.reshape(hidden, 1), w2p, b2p.reshape(out_pad, 1)


@functools.partial(jax.jit, static_argnames=("out_size", "block_b"))
def my_network_forward(x, w1t, b1c, w2t, b2c, *, out_size, block_b=2048):
    """x: (B, in).  w1t: (32, in), b1c: (32, 1), w2t: (out_pad, 32),
    b2c: (out_pad, 1) — as produced by prepare_params.  Returns (B, out)."""
    B, in_size = x.shape
    hidden = w1t.shape[0]
    out_pad = w2t.shape[0]

    # Batch tile = lane dim of x^T / out^T -> multiple of 128.  For large B,
    # target >= 2 balanced grid steps so the "parallel" axis feeds both
    # TensorCores on v7x; block_b caps the tile (default 2048 amortizes the
    # ~0.35 us fixed per-grid-step overhead).
    if B > _LANE:
        target = _round_up(pl.cdiv(B, 2), _LANE)
    else:
        target = _LANE
    tb = max(_LANE, _round_up(min(block_b, target), _LANE))
    grid_b = pl.cdiv(B, tb)
    b_pad = grid_b * tb

    # Feature-major activations: one cheap transpose(+pad) of the tiny x
    # array in the wrapper; padded columns are zeros and sliced off below.
    xt = x.T                                                   # (in, B)
    if b_pad != B:
        xt = jnp.pad(xt, ((0, 0), (0, b_pad - B)))

    flops = 2 * b_pad * (in_size * hidden + hidden * out_pad)
    bytes_accessed = 4 * (
        b_pad * in_size                       # x^T in
        + hidden * in_size + hidden           # w1, b1 (resident)
        + out_pad * hidden + out_pad          # w2, b2 (resident)
        + b_pad * out_pad                     # out^T
    )

    ot = pl.pallas_call(
        mlp_kernel,
        out_shape=jax.ShapeDtypeStruct((out_pad, b_pad), jnp.float32),
        grid_spec=pltpu.PrefetchScalarGridSpec(
            num_scalar_prefetch=0,
            grid=(grid_b,),
            in_specs=[
                # Activations stream per batch tile (double-buffered).
                pl.BlockSpec((in_size, tb), lambda i: (0, i)),
                # Weights/biases: constant block index -> stay hot in VMEM.
                pl.BlockSpec((hidden, in_size), lambda i: (0, 0)),
                pl.BlockSpec((hidden, 1), lambda i: (0, 0)),
                pl.BlockSpec((out_pad, hidden), lambda i: (0, 0)),
                pl.BlockSpec((out_pad, 1), lambda i: (0, 0)),
            ],
            out_specs=pl.BlockSpec((out_pad, tb), lambda i: (0, i)),
        ),
        compiler_params=pltpu.CompilerParams(
            # Batch tiles are independent -> shard across cores on v7x.
            dimension_semantics=("parallel",),
        ),
        cost_estimate=pl.CostEstimate(
            flops=flops, transcendentals=0, bytes_accessed=bytes_accessed
        ),
    )(xt, w1t, b1c, w2t, b2c)

    # Strip feature/batch padding and return row-major (B, out).
    return ot[:out_size, :B].T


def init_params(key, input_size, hidden, output_size):
    # PyTorch nn.Linear layout/init: W (out, in), b (out,), U(-1/sqrt(fan_in), ...).
    k1, k2, k3, k4 = jax.random.split(key, 4)
    bound1 = 1.0 / jnp.sqrt(input_size)
    bound2 = 1.0 / jnp.sqrt(hidden)
    w1 = jax.random.uniform(k1, (hidden, input_size), jnp.float32, -bound1, bound1)
    b1 = jax.random.uniform(k2, (hidden,), jnp.float32, -bound1, bound1)
    w2 = jax.random.uniform(k3, (output_size, hidden), jnp.float32, -bound2, bound2)
    b2 = jax.random.uniform(k4, (output_size,), jnp.float32, -bound2, bound2)
    return w1, b1, w2, b2


def _reference(x, w1, b1, w2, b2):
    # nn.Linear semantics: y = x @ W^T + b
    h = jnp.maximum(x @ w1.T + b1, 0.0)
    return h @ w2.T + b2


if __name__ == "__main__":
    # DQN-style state vector: input_size=8 (state dim), output_size=4 (actions).
    input_size, hidden, output_size = 8, 32, 4

    key = jax.random.PRNGKey(0)
    kx1, kx2, kx3, kp = jax.random.split(key, 4)
    w1, b1, w2, b2 = init_params(kp, input_size, hidden, output_size)
    w1t, b1c, w2t, b2c = prepare_params(w1, b1, w2, b2)

    # Case 1: tiny DQN inference batch (grid=1, lane-padded batch columns).
    # NOTE: at B=2 this path is fixed-overhead bound by construction; for a
    # deployed B~2 path, fusing this MLP into the producer of x (plain XLA)
    # beats any standalone Pallas call.
    x_small = jax.random.normal(kx1, (2, input_size), jnp.float32)
    out_small = jax.block_until_ready(
        my_network_forward(x_small, w1t, b1c, w2t, b2c, out_size=output_size))
    assert out_small.shape == (2, output_size)
    assert jnp.allclose(out_small, _reference(x_small, w1, b1, w2, b2),
                        atol=1e-5, rtol=1e-5)

    # Case 2: default block_b -> two balanced grid steps (v7x megacore path).
    x_mid = jax.random.normal(kx2, (300, input_size), jnp.float32)
    out_mid = jax.block_until_ready(
        my_network_forward(x_mid, w1t, b1c, w2t, b2c, out_size=output_size))
    assert out_mid.shape == (300, output_size)
    assert jnp.allclose(out_mid, _reference(x_mid, w1, b1, w2, b2),
                        atol=1e-5, rtol=1e-5)

    # Case 3: small tile -> ragged multi-step pipelined grid (grid=3).
    x_big = jax.random.normal(kx3, (300, input_size), jnp.float32)
    out_big = jax.block_until_ready(
        my_network_forward(x_big, w1t, b1c, w2t, b2c,
                           out_size=output_size, block_b=128))
    assert out_big.shape == (300, output_size)
    assert jnp.allclose(out_big, _reference(x_big, w1, b1, w2, b2),
                        atol=1e-5, rtol=1e-5)

    print("KERNEL_OK")
</pallas_src>

<mosaic_0001>
module attributes {stable_mosaic.version = 11 : i64} {
  func.func @mlp_kernel(%arg0: i32, %arg1: memref<8x128xf32, #tpu.memory_space<vmem>>, %arg2: memref<32x8xf32, #tpu.memory_space<vmem>>, %arg3: memref<32x1xf32, #tpu.memory_space<vmem>>, %arg4: memref<8x32xf32, #tpu.memory_space<vmem>>, %arg5: memref<8x1xf32, #tpu.memory_space<vmem>>, %arg6: memref<8x128xf32, #tpu.memory_space<vmem>>) attributes {dimension_semantics = [#tpu.dimension_semantics<parallel>], iteration_bounds = array<i64: 1>, scalar_prefetch = 0 : i64, scratch_operands = 0 : i64, tpu.core_type = #tpu.core_type<tc>, window_params = [{transform_indices = @transform_0, window_bounds = array<i64: 8, 128>}, {pipeline_mode = #tpu.pipeline_mode<synchronous>, transform_indices = @transform_1, window_bounds = array<i64: 32, 8>}, {pipeline_mode = #tpu.pipeline_mode<synchronous>, transform_indices = @transform_2, window_bounds = array<i64: 32, 1>}, {pipeline_mode = #tpu.pipeline_mode<synchronous>, transform_indices = @transform_3, window_bounds = array<i64: 8, 32>}, {pipeline_mode = #tpu.pipeline_mode<synchronous>, transform_indices = @transform_4, window_bounds = array<i64: 8, 1>}, {transform_indices = @transform_5, window_bounds = array<i64: 8, 128>}]} {
    %c0 = arith.constant 0 : index
    %c0_0 = arith.constant 0 : index
    %0 = vector.load %arg1[%c0, %c0_0] : memref<8x128xf32, #tpu.memory_space<vmem>>, vector<8x128xf32>
    %c0_1 = arith.constant 0 : index
    %c0_2 = arith.constant 0 : index
    %1 = vector.load %arg2[%c0_1, %c0_2] : memref<32x8xf32, #tpu.memory_space<vmem>>, vector<32x8xf32>
    %cst = arith.constant dense<0.000000e+00> : vector<32x128xf32>
    %2 = tpu.matmul %1, %0, %cst {dimension_numbers = #tpu.dot_dimension_numbers<[1], [0], [0], [1], [0, 0, 1, 1], [], []>} : vector<32x8xf32>, vector<8x128xf32>, vector<32x128xf32> -> vector<32x128xf32>
    %c0_3 = arith.constant 0 : index
    %c0_4 = arith.constant 0 : index
    %3 = vector.load %arg3[%c0_3, %c0_4] : memref<32x1xf32, #tpu.memory_space<vmem>>, vector<32x1xf32>
    %4 = vector.broadcast %3 : vector<32x1xf32> to vector<32x128xf32>
    %5 = arith.addf %2, %4 : vector<32x128xf32>
    %cst_5 = arith.constant 0.000000e+00 : f32
    %6 = vector.broadcast %cst_5 : f32 to vector<32x128xf32>
    %7 = arith.maximumf %5, %6 : vector<32x128xf32>
    %c0_6 = arith.constant 0 : index
    %c0_7 = arith.constant 0 : index
    %8 = vector.load %arg4[%c0_6, %c0_7] : memref<8x32xf32, #tpu.memory_space<vmem>>, vector<8x32xf32>
    %cst_8 = arith.constant dense<0.000000e+00> : vector<8x128xf32>
    %9 = tpu.matmul %8, %7, %cst_8 {dimension_numbers = #tpu.dot_dimension_numbers<[1], [0], [0], [1], [0, 0, 1, 1], [], []>} : vector<8x32xf32>, vector<32x128xf32>, vector<8x128xf32> -> vector<8x128xf32>
    %c0_9 = arith.constant 0 : index
    %c0_10 = arith.constant 0 : index
    %10 = vector.load %arg5[%c0_9, %c0_10] : memref<8x1xf32, #tpu.memory_space<vmem>>, vector<8x1xf32>
    %11 = vector.broadcast %10 : vector<8x1xf32> to vector<8x128xf32>
    %12 = arith.addf %9, %11 : vector<8x128xf32>
    %c0_11 = arith.constant 0 : index
    %c0_12 = arith.constant 0 : index
    %13 = vector.load %arg6[%c0_11, %c0_12] : memref<8x128xf32, #tpu.memory_space<vmem>>, vector<8x128xf32>
    tpu.vector_store %arg6[%c0_11, %c0_12], %12 {strides = array<i32>} : memref<8x128xf32, #tpu.memory_space<vmem>>, vector<8x128xf32>,
    return
  }
  func.func @transform_0(%arg0: i32) -> (i32, i32) {
    %c0_i32 = arith.constant 0 : i32
    %c0_i32_0 = arith.constant 0 : i32
    return %c0_i32, %arg0 : i32, i32
  }
  func.func @transform_1(%arg0: i32) -> (i32, i32) {
    %c0_i32 = arith.constant 0 : i32
    %c0_i32_0 = arith.constant 0 : i32
    %c0_i32_1 = arith.constant 0 : i32
    return %c0_i32, %c0_i32_0 : i32, i32
  }
  func.func @transform_2(%arg0: i32) -> (i32, i32) {
    %c0_i32 = arith.constant 0 : i32
    %c0_i32_0 = arith.constant 0 : i32
    %c0_i32_1 = arith.constant 0 : i32
    return %c0_i32, %c0_i32_0 : i32, i32
  }
  func.func @transform_3(%arg0: i32) -> (i32, i32) {
    %c0_i32 = arith.constant 0 : i32
    %c0_i32_0 = arith.constant 0 : i32
    %c0_i32_1 = arith.constant 0 : i32
    return %c0_i32, %c0_i32_0 : i32, i32
  }
  func.func @transform_4(%arg0: i32) -> (i32, i32) {
    %c0_i32 = arith.constant 0 : i32
    %c0_i32_0 = arith.constant 0 : i32
    %c0_i32_1 = arith.constant 0 : i32
    return %c0_i32, %c0_i32_0 : i32, i32
  }
  func.func @transform_5(%arg0: i32) -> (i32, i32) {
    %c0_i32 = arith.constant 0 : i32
    %c0_i32_0 = arith.constant 0 : i32
    return %c0_i32, %arg0 : i32, i32
  }
}

</mosaic_0001>

<bundles_post_ra>
// kernel: my_network_forward.1
= control target key start
LH: loop header
LB: loop body
LE: loop exit
PB: predicated region body
PF: predicated region fallthrough
CT: control target
= control target key end

     0   :  { %vm49_vm0 = vcmask 64512   ;;  %v276_v3 = vmov 0   ;;  %v277_v11 = vmov 0.0   ;;  %vm278_vm1 = vmmov 0   ;;  %s349_s0 = inlined_call_operand.vmem [shape: f32[8,128], index: 0, kind: input, shape index: {}]   ;;  %s350_s1 = inlined_call_operand.vmem [shape: f32[32,8], index: 1, kind: input, shape index: {}]   ;;  %s351_s2 = inlined_call_operand.vmem [shape: f32[32,1], index: 2, kind: input, shape index: {}]   ;;  %s352_s4 = inlined_call_operand.vmem [shape: f32[8,1], index: 4, kind: input, shape index: {}]   ;;  %s353_s3 = inlined_call_operand.vmem [shape: f32[8,32], index: 3, kind: input, shape index: {}]   ;;  %s354_s5 = inlined_call_operand.vmem [shape: f32[8,128], index: 5, kind: output, shape index: {}]  }
   0x1   :  { %v20_v0 = vld [vmem:[%s349_s0] sm:$0xff]  ;;  %v22_v2 = vld [vmem:[%s350_s1 + $0x8] sm:$0xff]  ;;  %274 = vset.pattern.permute.xlu0 %v276_v3  ;;  %275 = vset.pattern.permute.xlu1 %v276_v3  ;;  %v23_v4 = vld [vmem:[%s350_s1 + $0x10] sm:$0xff]  ;;  %vm158_vm2 = vcmask 261120  }
   0x2   :  { %v21_v1 = vld [vmem:[%s350_s1] sm:$0xff]  ;;  %252 = vmatprep.subr.mxu0 %v20_v0  ;;  %v28_v5 = vld [vmem:[%s351_s2 + $0x18] sm:$0xff]  ;;  %v26_v6 = vld [vmem:[%s351_s2 + $0x8] sm:$0xff]  ;;  %260 = vmatprep.subr.mxu1 %v277_v11 }
   0x3   :  { %254 = vmatprep.mubr.msk.f32.mxu0 %vm49_vm0, %v21_v1  ;;  %253 = vmatpush3.msra.mxu0 %v20_v0  ;;  %v27_v7 = vld [vmem:[%s351_s2 + $0x10] sm:$0xff]  ;;  %v24_v8 = vld [vmem:[%s350_s1 + $0x18] sm:$0xff]  ;;  %v25_v9 = vld [vmem:[%s351_s2] sm:$0xff] }
   0x4   :  { %46 = vperm.xlu0 %274, %v28_v5   ;;  %255 = vmatmul.mubr.msk.f32.vlgmr.msra.gmra.mxu0 %vm49_vm0, %v22_v2  ;;  %v152_v10 = vld [vmem:[%s352_s4] sm:$0xff] }
   0x5   :  { %36 = vperm.xlu1 %275, %v26_v6   ;;  %257 = vmatprep.mubr.msk.f32.mxu0 %vm49_vm0, %v23_v4  ;;  %v151_v28 = vld [vmem:[%s353_s3] sm:$0xff] }
   0x6   :  { %268 = vmatprep.mubr.msk.f32.mxu1 %vm278_vm1, %v277_v11 }
   0x8   :  { %41 = vperm.xlu0 %274, %v27_v7   ;;  %258 = vmatmul.mubr.msk.f32.gmra.mxu0 %vm49_vm0, %v24_v8 }
   0x9   :  { %31 = vperm.xlu1 %275, %v25_v9  }
   0xc   :  { %155 = vperm.xlu0 %274, %v152_v10  }
  0x7f   :  { %v47_v12 = vpop.permute.xlu0 %46 }
  0x80   :  { %v37_v13 = vpop.permute.xlu1 %36 }
  0x83   :  { %v42_v17 = vpop.permute.xlu0 %41 }
  0x84   :  { %v32_v19 = vpop.permute.xlu1 %31 }
  0x87   :  { %v156_v29 = vpop.permute.xlu0 %155 }
  0xc4   :  { %v256_v14 = vpop.f32.mrf.mxu0 }
  0xc5   :  { %v134_v21 = vadd.f32 %v256_v14, %v37_v13 }
  0xc6   :  { %v128_v15 = vpop.f32.mrf.mxu0 }
  0xc7   :  { %v129_v24 = vadd.f32 %v128_v15, %v32_v19  ;;  %v148_v26 = vmax.f32 %v134_v21, 0.0 }
  0xc8   :  { %v259_v16 = vpop.f32.mrf.mxu0 }
  0xc9   :  { %v144_v18 = vadd.f32 %v259_v16, %v47_v12  ;;  %v147_v27 = vmax.f32 %v129_v24, 0.0 }
  0xca   :  { %v138_v20 = vpop.f32.mrf.mxu0 }
  0xcb   :  { %v150_v22 = vmax.f32 %v144_v18, 0.0  ;;  %v139_v23 = vadd.f32 %v138_v20, %v42_v17 }
  0xcd   :  { %v149_v25 = vmax.f32 %v139_v23, 0.0  ;;  %261 = vmatpush3.msra.mxu1 %v150_v22 }
  0xce   :  { %262 = vmatprep.subr.mxu1 %v277_v11 }
  0xcf   :  { %263 = vmatpush3.msra.mxu1 %v149_v25 }
  0xd0   :  { %264 = vmatprep.subr.mxu1 %v277_v11 }
  0xd1   :  { %265 = vmatpush3.msra.mxu1 %v148_v26 }
  0xd2   :  { %266 = vmatprep.subr.mxu1 %v277_v11 }
  0xd3   :  { %267 = vmatpush3.msra.mxu1 %v147_v27 }
  0xd4   :  { %269 = vmatmul.mubr.msk.f32.vlgmr.msra.gmra.mxu1 %vm158_vm2, %v151_v28 }
 0x194   :  { %v228_v30 = vpop.f32.mrf.mxu1 }
 0x195   :  { %v229_v31 = vadd.f32 %v228_v30, %v156_v29 }
 0x196   :  { %v270_v32 = vpop.f32.mrf.mxu1 }
 0x197   :  { %232 = vst [vmem:[%s354_s5] sm:$0xff] %v229_v31 }

</bundles_post_ra>
